<compile_context>
chip_gen: v7x
topology: tpu7x:2x2x1
jax: 0.10.0
libtpu: 0.0.40
codegen_flags: <defaults>
</compile_context>

<pallas_src>
import functools
import math

import jax
import jax.numpy as jnp
from jax.experimental import pallas as pl
from jax.experimental.pallas import tpu as pltpu


_LANES = 128

# Degree-11 odd minimax polynomial for atan(t), t in [0, 1]; max error ~2e-6
# rad (~1.2e-4 deg) — ample headroom vs. the 1e-3-degree tolerance, and two
# Horner terms (4 VALU ops/elem) cheaper than the previous degree-15 fit.
# Hand-rolled so the kernel only uses +,*,select,sqrt,rcp (all Mosaic-lowerable);
# atan2 itself has no guaranteed TPU lowering.
_ATAN_COEFFS = (
    0.99997726, -0.33262347, 0.19354346,
    -0.11643287, 0.05265332, -0.01172120,
)


def _cart2polar_kernel(in_ref, out_ref, *, degrees: bool):
    """Lane-interleaved (x, y) tile -> lane-interleaved (r, phi) tile.

    The tile is a (bm, 128) slab of the flattened (batch, points, 2) array:
    even lanes hold x, odd lanes hold y (row width 128 is even, so lane parity
    is preserved across rows).  Partner coordinates come from two XLU rolls;
    the reciprocal and sqrt run on the EUP; everything else stays on the VPU.
    """
    t = in_ref[...].astype(jnp.float32)

    # Lane-parity mask (x on even lanes); `& 1` keeps it to a cheap bitwise op
    # + compare per vreg.
    lane = jax.lax.broadcasted_iota(jnp.int32, t.shape, dimension=1)
    is_x = (lane & 1) == 0

    nxt = pltpu.roll(t, shift=_LANES - 1, axis=1)   # value from lane i+1
    prv = pltpu.roll(t, shift=1, axis=1)            # value from lane i-1
    # Two selects (no `partner` intermediate): one fewer VALU op/elem.
    x = jnp.where(is_x, t, prv)
    y = jnp.where(is_x, nxt, t)

    # atan2(y, x) via range reduction to q = min(|x|,|y|)/max(|x|,|y|) in
    # [0, 1].  rad2deg is folded into the polynomial coefficients and quadrant
    # constants so no extra full-vector multiply is needed.
    scale = (180.0 / math.pi) if degrees else 1.0
    coeffs = tuple(float(c) * scale for c in _ATAN_COEFFS)
    half_pi = jnp.float32((math.pi / 2.0) * scale)
    full_pi = jnp.float32(math.pi * scale)

    ax = jnp.abs(x)
    ay = jnp.abs(y)
    num = jnp.minimum(ax, ay)
    den = jnp.maximum(ax, ay)

    # Divide -> EUP reciprocal (approx) + one Newton step (~1e-6 rel error),
    # moving the reciprocal off the saturated VALU slot.  den == 0 yields
    # inf/NaN here, which the where() discards (no traps on TPU) — don't
    # "fix" this into a branch.
    rcp = pl.reciprocal(den, approx=True)
    rcp = rcp * (2.0 - den * rcp)                     # Newton refinement
    q = jnp.where(den > 0.0, num * rcp, jnp.float32(0.0))
    q2 = q * q

    # range / radius, hypot-style: reuses den/q2, overflow-safe; den==0 -> r=0.
    r = den * jnp.sqrt(1.0 + q2)

    p = jnp.float32(coeffs[-1])
    for c in coeffs[-2::-1]:
        p = p * q2 + jnp.float32(c)
    p = p * q                                         # scale * atan(min/max)

    p = jnp.where(ay > ax, half_pi - p, p)            # undo reciprocal reduction
    p = jnp.where(x < 0.0, full_pi - p, p)            # quadrants II / III
    phi = jnp.where(y < 0.0, -p, p)                   # lower half-plane sign
    # TODO(synk): signed-zero / infinite-argument edge cases (e.g.
    # atan2(-0.0, -1.0), atan2(inf, inf)) differ from IEEE atan2 / torch.arctan2.

    out_ref[...] = jnp.where(is_x, r, phi).astype(out_ref.dtype)


def cart2polar_pallas(batch: jax.Array, degrees: bool = True,
                      block_rows: int = 4096) -> jax.Array:
    """Pallas equivalent of Cart2Polar(dim=-1, degrees=degrees)(batch)."""
    # TODO(synk): only self.dim == -1 (the module default) is implemented.
    assert batch.ndim == 3 and batch.shape[-1] == 2, "expected (batch, points, 2)"
    B, P, _ = batch.shape
    dtype = batch.dtype
    itemsize = jnp.dtype(dtype).itemsize

    # Free view of the contiguous (B, P, 2) array as a lane-dense 2D slab of
    # the interleaved [x0, y0, x1, y1, ...] stream.
    total = B * P * 2
    pad = (-total) % _LANES
    flat = batch.reshape(total)
    if pad:
        # TODO(synk): slow path — pad + trailing slice re-stream the tensor
        # through HBM.  Only hit when B*P is not a multiple of 64.
        flat = jnp.pad(flat, (0, pad))
    rows = (total + pad) // _LANES
    flat = flat.reshape(rows, _LANES)

    # Sublane granularity: 8 rows for 32-bit dtypes, 16 for bf16, 32 for 8-bit.
    sub = max(8, 32 // itemsize)

    # Block selection: biggest block that (a) fits comfortably in scoped VMEM
    # (4096 rows f32 = 2 MiB/buffer, ~8 MiB double-buffered in+out) and
    # (b) keeps the "parallel" grid at >= 2 steps so both v7x TensorCores get
    # work (v5e/v6e have a single TC; the cap costs nothing there).
    if rows < 2 * sub:
        bm = rows                                   # block == full dim: legal
    else:
        half = ((pl.cdiv(rows, 2) + sub - 1) // sub) * sub
        bm = min(block_rows, half)
        bm = max(sub, (bm // sub) * sub)
    grid = (pl.cdiv(rows, bm),)

    spec = pl.BlockSpec((bm, _LANES), lambda i: (i, 0))
    cost = pl.CostEstimate(
        flops=32 * rows * _LANES,
        transcendentals=2 * rows * _LANES,          # sqrt + reciprocal (EUP)
        bytes_accessed=2 * rows * _LANES * itemsize,
    )

    out = pl.pallas_call(
        functools.partial(_cart2polar_kernel, degrees=degrees),
        out_shape=jax.ShapeDtypeStruct((rows, _LANES), dtype),
        grid=grid,
        in_specs=[spec],
        out_specs=spec,
        compiler_params=pltpu.CompilerParams(
            dimension_semantics=("parallel",)),
        cost_estimate=cost,
    )(flat)

    out = out.reshape(rows * _LANES)
    if pad:
        out = out[:total]
    return out.reshape(B, P, 2)


if __name__ == "__main__":
    key = jax.random.PRNGKey(0)
    B, P = 2, 512
    batch = jax.random.normal(key, (B, P, 2), dtype=jnp.float32)

    out = jax.block_until_ready(cart2polar_pallas(batch, degrees=True))

    # pure-JAX reference
    x, y = batch[..., 0], batch[..., 1]
    ref = jnp.stack(
        [jnp.sqrt(x * x + y * y), jnp.degrees(jnp.arctan2(y, x))], axis=-1)

    assert out.shape == (B, P, 2) and out.dtype == jnp.float32
    assert bool(jnp.allclose(out, ref, atol=1e-3, rtol=1e-5)), "mismatch vs reference"
    print("KERNEL_OK")
</pallas_src>

<mosaic_0001>
module attributes {stable_mosaic.version = 11 : i64} {
  func.func @_cart2polar_kernel(%arg0: i32, %arg1: memref<8x128xf32, #tpu.memory_space<vmem>>, %arg2: memref<8x128xf32, #tpu.memory_space<vmem>>) attributes {dimension_semantics = [#tpu.dimension_semantics<parallel>], iteration_bounds = array<i64: 2>, scalar_prefetch = 0 : i64, scratch_operands = 0 : i64, tpu.core_type = #tpu.core_type<tc>, window_params = [{transform_indices = @transform_0, window_bounds = array<i64: 8, 128>}, {transform_indices = @transform_1, window_bounds = array<i64: 8, 128>}]} {
    %c0 = arith.constant 0 : index
    %c0_0 = arith.constant 0 : index
    %0 = vector.load %arg1[%c0, %c0_0] : memref<8x128xf32, #tpu.memory_space<vmem>>, vector<8x128xf32>
    %1 = tpu.iota {dimensions = array<i32: 1>} : vector<8x128xi32>
    %c1_i32 = arith.constant 1 : i32
    %2 = vector.broadcast %c1_i32 : i32 to vector<8x128xi32>
    %3 = arith.andi %1, %2 : vector<8x128xi32>
    %c0_i32 = arith.constant 0 : i32
    %4 = vector.broadcast %c0_i32 : i32 to vector<8x128xi32>
    %5 = arith.cmpi eq, %3, %4 : vector<8x128xi32>
    %c127_i32 = arith.constant 127 : i32
    %6 = tpu.dynamic_rotate %0 by %c127_i32 dim 1 : vector<8x128xf32>, i32 -> vector<8x128xf32>
    %c1_i32_1 = arith.constant 1 : i32
    %7 = tpu.dynamic_rotate %0 by %c1_i32_1 dim 1 : vector<8x128xf32>, i32 -> vector<8x128xf32>
    %8 = arith.select %5, %0, %7 : vector<8x128xi1>, vector<8x128xf32>
    %9 = arith.select %5, %6, %0 : vector<8x128xi1>, vector<8x128xf32>
    %10 = math.absf %8 : vector<8x128xf32>
    %11 = math.absf %9 : vector<8x128xf32>
    %12 = arith.minimumf %10, %11 : vector<8x128xf32>
    %13 = arith.maximumf %10, %11 : vector<8x128xf32>
    %14 = tpu.reciprocal %13 {approx = true} : vector<8x128xf32> -> vector<8x128xf32>
    %15 = arith.mulf %13, %14 : vector<8x128xf32>
    %cst = arith.constant 2.000000e+00 : f32
    %16 = vector.broadcast %cst : f32 to vector<8x128xf32>
    %17 = arith.subf %16, %15 : vector<8x128xf32>
    %18 = arith.mulf %14, %17 : vector<8x128xf32>
    %cst_2 = arith.constant 0.000000e+00 : f32
    %19 = vector.broadcast %cst_2 : f32 to vector<8x128xf32>
    %20 = arith.cmpf ogt, %13, %19 : vector<8x128xf32>
    %21 = arith.mulf %12, %18 : vector<8x128xf32>
    %cst_3 = arith.constant 0.000000e+00 : f32
    %22 = vector.broadcast %cst_3 : f32 to vector<8x128xf32>
    %23 = arith.select %20, %21, %22 : vector<8x128xi1>, vector<8x128xf32>
    %24 = arith.mulf %23, %23 : vector<8x128xf32>
    %cst_4 = arith.constant 1.000000e+00 : f32
    %25 = vector.broadcast %cst_4 : f32 to vector<8x128xf32>
    %26 = arith.addf %25, %24 : vector<8x128xf32>
    %27 = math.sqrt %26 : vector<8x128xf32>
    %28 = arith.mulf %13, %27 : vector<8x128xf32>
    %cst_5 = arith.constant -0.671575308 : f32
    %29 = vector.broadcast %cst_5 : f32 to vector<8x128xf32>
    %30 = arith.mulf %29, %24 : vector<8x128xf32>
    %cst_6 = arith.constant 3.01681304 : f32
    %31 = vector.broadcast %cst_6 : f32 to vector<8x128xf32>
    %32 = arith.addf %30, %31 : vector<8x128xf32>
    %33 = arith.mulf %32, %24 : vector<8x128xf32>
    %cst_7 = arith.constant -6.67111206 : f32
    %34 = vector.broadcast %cst_7 : f32 to vector<8x128xf32>
    %35 = arith.addf %33, %34 : vector<8x128xf32>
    %36 = arith.mulf %35, %24 : vector<8x128xf32>
    %cst_8 = arith.constant 11.0892239 : f32
    %37 = vector.broadcast %cst_8 : f32 to vector<8x128xf32>
    %38 = arith.addf %36, %37 : vector<8x128xf32>
    %39 = arith.mulf %38, %24 : vector<8x128xf32>
    %cst_9 = arith.constant -19.0579205 : f32
    %40 = vector.broadcast %cst_9 : f32 to vector<8x128xf32>
    %41 = arith.addf %39, %40 : vector<8x128xf32>
    %42 = arith.mulf %41, %24 : vector<8x128xf32>
    %cst_10 = arith.constant 57.2944756 : f32
    %43 = vector.broadcast %cst_10 : f32 to vector<8x128xf32>
    %44 = arith.addf %42, %43 : vector<8x128xf32>
    %45 = arith.mulf %44, %23 : vector<8x128xf32>
    %46 = arith.cmpf ogt, %11, %10 : vector<8x128xf32>
    %cst_11 = arith.constant 9.000000e+01 : f32
    %47 = vector.broadcast %cst_11 : f32 to vector<8x128xf32>
    %48 = arith.subf %47, %45 : vector<8x128xf32>
    %49 = arith.select %46, %48, %45 : vector<8x128xi1>, vector<8x128xf32>
    %cst_12 = arith.constant 0.000000e+00 : f32
    %50 = vector.broadcast %cst_12 : f32 to vector<8x128xf32>
    %51 = arith.cmpf olt, %8, %50 : vector<8x128xf32>
    %cst_13 = arith.constant 1.800000e+02 : f32
    %52 = vector.broadcast %cst_13 : f32 to vector<8x128xf32>
    %53 = arith.subf %52, %49 : vector<8x128xf32>
    %54 = arith.select %51, %53, %49 : vector<8x128xi1>, vector<8x128xf32>
    %cst_14 = arith.constant 0.000000e+00 : f32
    %55 = vector.broadcast %cst_14 : f32 to vector<8x128xf32>
    %56 = arith.cmpf olt, %9, %55 : vector<8x128xf32>
    %cst_15 = arith.constant 0.000000e+00 : f32
    %57 = vector.broadcast %cst_15 : f32 to vector<8x128xf32>
    %58 = arith.subf %57, %54 : vector<8x128xf32>
    %59 = arith.select %56, %58, %54 : vector<8x128xi1>, vector<8x128xf32>
    %60 = arith.select %5, %28, %59 : vector<8x128xi1>, vector<8x128xf32>
    %c0_16 = arith.constant 0 : index
    %c0_17 = arith.constant 0 : index
    %61 = vector.load %arg2[%c0_16, %c0_17] : memref<8x128xf32, #tpu.memory_space<vmem>>, vector<8x128xf32>
    tpu.vector_store %arg2[%c0_16, %c0_17], %60 {strides = array<i32>} : memref<8x128xf32, #tpu.memory_space<vmem>>, vector<8x128xf32>,
    return
  }
  func.func @transform_0(%arg0: i32) -> (i32, i32) {
    %c0_i32 = arith.constant 0 : i32
    %c0_i32_0 = arith.constant 0 : i32
    return %arg0, %c0_i32 : i32, i32
  }
  func.func @transform_1(%arg0: i32) -> (i32, i32) {
    %c0_i32 = arith.constant 0 : i32
    %c0_i32_0 = arith.constant 0 : i32
    return %arg0, %c0_i32 : i32, i32
  }
}

</mosaic_0001>

<bundles_post_ra>
// kernel: tpu_custom_call.1
= control target key start
LH: loop header
LB: loop body
LE: loop exit
PB: predicated region body
PF: predicated region fallthrough
CT: control target
= control target key end

     0   :  { %6 = vsyncpa [#allocation3], 0  ;;  %s621_s0 = inlined_call_operand.hbm [shape: f32[16,128], index: 0, kind: input, shape index: {}]   ;;  %s622_s1 = inlined_call_operand.hbm [shape: f32[16,128], index: 1, kind: output, shape index: {}]  }
   0x1   :  { %8 = vsyncpa [#allocation3 + $0x1], 0 }
   0x2   :  { %9 = vsyncpa [#allocation4], 0 }
   0x3   :  { %11 = vsyncpa [#allocation4 + $0x1], 0  ;;  %s446_s6 = smov 0   ;;  %s448_s7 = smov 0  }
   0x4   :  { %s450_s8 = smov 0   ;;  %s452_s9 = smov 0  }
   0x5 LB: > { %s467_s10 = sadd.s32 4294967295, %s430_s9   ;;  %s270_s11 = sadd.s32 4294967294, %s430_s9   ;;  %s430_s9 = sphi %s452_s9, %s639_s9   ;;  %s426_s8 = sphi %s450_s8, %s638_s8   ;;  %s422_s7 = sphi %s448_s7, %s637_s7   ;;  %s418_s6 = sphi %s446_s6, %s636_s6  }
   0x6   : > { %s471_s12 = sadd.s32 1, %s430_s9   ;;  %s24_s13 = sadd.s32 1, %s426_s8 }
   0x7   : > { %s21_s14 = ssub.s32 %s430_s9, %s471_s12  ;;  %p31_p0 = scmp.ne.s32.totalorder %s426_s8, %s422_s7 }
   0x8   : > { %p22_p1 = scmp.eq.s32.totalorder %s21_s14, 0  ;;  %p32_p2 = scmp.eq.s32.totalorder %s430_s9, 0 }
   0x9   : > { %p37_p3 = scmp.ne.s32.totalorder %s422_s7, %s418_s6  ;;  %p38_p4 = scmp.eq.s32.totalorder %s467_s10, 0 }
   0xa   : > { %s483_s15 = scalar_select %p22_p1, %s426_s8, %s24_s13  }
   0xb   : > { %p485_p5 = por %p32_p2, %p31_p0  ;;  %p489_p6 = por %p38_p4, %p37_p3 }
   0xc   : > { %p61_p7 = scmp.eq.s32.totalorder %s467_s10, 1  ;;  %p67_p8 = scmp.eq.s32.totalorder %s270_s11, 1 }
   0xd   : > { %p294_p10 = scmp.lt.s32.totalorder %s430_s9, 2  ;;  %s87_s20 = sand.u32 1, %s426_s8  }
   0xe   : > { %p496_p11 = por %p61_p7, %p31_p0  ;;  %p500_p12 = por %p67_p8, %p37_p3 }
   0xf   : > { %s274_s21 = sshll.u32 %s430_s9, 7  ;;  %s273_s22 = sshll.u32 %s87_s20, 3 }
  0x10   : > { %s626_s18 = scalar_select %p496_p11, 1, 0 }
  0x11   : > { %s627_s19 = scalar_select %p500_p12, 1, 0 }
  0x12   : > { %s509_s25 = scalar_lea.hbm %s621_s0, %s274_s21  ;;  %s91_s26 = scalar_lea.vmem [#allocation2], %s273_s22 }
  0x13   : > { %s98_s27 = sshll.u32 %s91_s26, 4  ;;  %p513_p13 = pnand %p294_p10, %p485_p5  ;;  %s517_s27 = int_to_ptr.vmem [resolvable:$true] %s98_s27 }
  0x14   : > { %s88_s29 = scalar_lea.sflag [#allocation3], %s87_s20  ;;  %s334_s30 = scalar_lea.hbm %s509_s25, 128 }
  0x15   : > { %p335_p2 = scmp.ne.s32.totalorder %s509_s25, %s334_s30  ;;  %p336_p3 = pneg %p513_p13 }
  0x16   : > { %s339_s4 = scalar_lea.hbm %s621_s0, 256  ;;  %p340_p5 = scmp.lt.u32.totalorder %s509_s25, %s621_s0 }
  0x17   : > { %p337_p4 = pnand %p336_p3, %p335_p2  ;;  %p341_p8 = scmp.lt.u32.totalorder %s339_s4, %s334_s30 }
  0x18   : > { %p343_p9 = scmp.lt.u32.totalorder %s334_s30, %s509_s25 }
  0x19   : > { %p338_p7 = pneg %p337_p4  ;;  %p342_p10 = por %p341_p8, %p340_p5 }
  0x1b   : > { %p344_p0 = por %p343_p9, %p342_p10 }
  0x1d   : > { %p345_p1 = pnand %p344_p0, %p338_p7 }
  0x1f   : > { %348 = shalt.err (!%p345_p1)
}
  0x20   : > { %s349_s13 = scalar_lea.vmem %s517_s27, 128  ;;  %s432_s14 = smov [#allocation2]  }
  0x21   : > { %p350_p2 = scmp.ne.s32.totalorder %s517_s27, %s349_s13  ;;  %s354_s16 = sshll.u32 %s432_s14, 4  ;;  %s355_s16 = int_to_ptr.vmem [resolvable:$false] %s354_s16 }
  0x22   : > { %s356_s20 = scalar_lea.vmem %s355_s16, 256  ;;  %p357_p11 = scmp.lt.s32.totalorder %s517_s27, %s355_s16 }
  0x23   : > { %p352_p4 = pnand %p350_p2, %p336_p3  ;;  %p358_p5 = scmp.lt.s32.totalorder %s356_s20, %s349_s13 }
  0x25   : > { %p353_p12 = pneg %p352_p4  ;;  %p359_p8 = por %p358_p5, %p357_p11 }
  0x27   : > { %p360_p9 = pnand %p359_p8, %p353_p12 }
  0x29   : > { %363 = shalt.err (!%p360_p9)
}
  0x2a   : > { %289 = dma.hbm_to_vmem [thread:$0]  (!%p513_p13), %s509_s25, 128, %s517_s27, %s88_s29  }
  0x2b   : > { %p629_p0 = scmp.lt.s32.totalorder %s430_s9, 3  ;;  %p630_p1 = scmp.ge.s32.totalorder %s430_s9, 1 }
  0x2d   : > { %p104_p3 = pnand %p630_p1, %p629_p0 }
  0x2e   : > { %s551_s21 = sand.u32 (!%p104_p3), 1, %s422_s7  }
  0x2f   : > { %107 = sbr.rel (%p104_p3) target bundleno = 248 (0xf8), region = 24  ;;  %s276_s22 = sshll.u32 (!%p104_p3), %s551_s21, 3 }
  0x30   : > { %s110_s23 = scalar_lea.sflag (!%p104_p3), [#allocation3], %s551_s21  ;;  %s113_s24 = scalar_lea.vmem (!%p104_p3), [#allocation2], %s276_s22 }
  0x36   : > { %409 = dma.done.wait (%p489_p6), %s110_s23, 128  }
  0x37   : > { %411 = vsyncadd (%p489_p6), %s110_s23, 4294967168  ;;  %v132_v0 = vld [vmem:[%s113_s24] sm:$0xff]  ;;  %s433_s25 = smov 127   ;;  %s434_s26 = smov 1   ;;  %v133_v1 = vlaneseq }
  0x38   : > { %137 = vrot.lane.b32.xlu0 %v132_v0, %s433_s25  ;;  %s279_s17 = sshll.u32 %s467_s10, 7  ;;  %s131_s27 = scalar_lea.vmem [#allocation5], %s276_s22 }
  0x39   : > { %v134_v2 = vand.u32 127, %v133_v1  ;;  %s200_s28 = sshll.u32 %s131_s27, 4  ;;  %s575_s2 = scalar_lea.hbm %s622_s1, %s279_s17  ;;  %s577_s28 = int_to_ptr.vmem [resolvable:$true] %s200_s28 }
  0x3a   : > { %s187_s10 = scalar_lea.sflag [#allocation4], %s551_s21  ;;  %s364_s3 = scalar_lea.vmem %s577_s28, 128 }
  0x3b   : > { %v135_v3 = vand.u32 1, %v134_v2  ;;  %p365_p6 = scmp.ne.s32.totalorder %s577_s28, %s364_s3  ;;  %p633_p11 = scmp.ne.s32.totalorder %s626_s18, 0 }
  0x3c   : > { %139 = vrot.lane.b32.xlu0 %v132_v0, %s434_s26  ;;  %s435_s4 = smov [#allocation5]  }
  0x3d   : > { %vm561_vm0 = vcmp.eq.s32.totalorder %v135_v3, 0  ;;  %p366_p12 = pnand %p365_p6, %p633_p11  ;;  %s368_s5 = sshll.u32 %s435_s4, 4  ;;  %s369_s5 = int_to_ptr.vmem [resolvable:$false] %s368_s5 }
  0x3e   : > { %s370_s11 = scalar_lea.vmem %s369_s5, 256  ;;  %p371_p7 = scmp.lt.s32.totalorder %s577_s28, %s369_s5 }
  0x3f   : > { %p367_p13 = pneg %p366_p12  ;;  %p372_p10 = scmp.lt.s32.totalorder %s370_s11, %s364_s3 }
  0x41   : > { %p373_p2 = por %p372_p10, %p371_p7 }
  0x43   : > { %p374_p4 = pnand %p373_p2, %p367_p13 }
  0xaa   : > { %v138_v5 = vpop.permute.xlu0 %137 }
  0xab   : > { %v142_v6 = vsel %vm561_vm0, %v138_v5, %v132_v0 }
  0xac   : > { %v144_v9 = vand.u32 2147483647, %v142_v6  ;;  %vm181_vm6 = vcmp.lt.f32.partialorder %v142_v6, 0.0 }
  0xae   : > { %v140_v7 = vpop.permute.xlu0 %139 }
  0xaf   : > { %v141_v8 = vsel %vm561_vm0, %v132_v0, %v140_v7 }
  0xb0   : > { %v143_v10 = vand.u32 2147483647, %v141_v8  ;;  %vm178_vm5 = vcmp.lt.f32.partialorder %v141_v8, 0.0 }
  0xb2   : > { %v146_v11 = vmax.f32 %v143_v10, %v144_v9  ;;  %v145_v15 = vmin.f32 %v143_v10, %v144_v9  ;;  %vm175_vm3 = vcmp.gt.f32.partialorder %v144_v9, %v143_v10 }
  0xb4   : > { %330 = vrcp.f32 %v146_v11  ;;  %vm151_vm1 = vcmp.gt.f32.partialorder %v146_v11, 0.0 }
  0xbe   : > { %v331_v12 = vpop.eup %330 }
  0xbf   : > { %v148_v13 = vmul.f32 %v331_v12, %v146_v11 }
  0xc1   : > { %v149_v14 = vsub.f32 2.0, %v148_v13 }
  0xc3   : > { %v150_v16 = vmul.f32 %v331_v12, %v149_v14 }
  0xc5   : > { %v152_v17 = vmul.f32 %v150_v16, %v145_v15 }
  0xc7   : > { %v153_v18 = vsel %vm151_vm1, %v152_v17, 0.0 }
  0xc8   : > { %v154_v19 = vmul.f32 %v153_v18, %v153_v18 }
  0xca   : > { %v164_v20 = vmul.f32 -0.6715753, %v154_v19  ;;  %v155_v21 = vadd.f32 1.0, %v154_v19 }
  0xcc   : > { %v165_v22 = vadd.f32 3.016813, %v164_v20  ;;  %332 = vrsqrt.f32 %v155_v21  ;;  %vm158_vm2 = vcmp.eq.f32.partialorder %v155_v21, inf  ;;  %v161_v37 = vand.u32 2147483648, %v155_v21 }
  0xcd   : > { %vm160_vm4 = vcmp.eq.f32.partialorder %v155_v21, 0.0 }
  0xce   : > { %v166_v23 = vmul.f32 %v165_v22, %v154_v19 }
  0xd0   : > { %v167_v24 = vadd.f32 -6.671112, %v166_v23 }
  0xd2   : > { %v168_v25 = vmul.f32 %v167_v24, %v154_v19 }
  0xd4   : > { %v169_v26 = vadd.f32 11.089224, %v168_v25 }
  0xd6   : > { %v170_v27 = vmul.f32 %v169_v26, %v154_v19  ;;  %v333_v29 = vpop.eup %332 }
  0xd7   : > { %v157_v32 = vmul.f32 %v333_v29, %v155_v21 }
  0xd8   : > { %v171_v28 = vadd.f32 -19.05792, %v170_v27 }
  0xd9   : > { %v159_v35 = vsel %vm158_vm2, %v155_v21, %v157_v32 }
  0xda   : > { %v172_v30 = vmul.f32 %v171_v28, %v154_v19  ;;  %v162_v39 = vsel %vm160_vm4, %v161_v37, %v159_v35 }
  0xdb   : > { %v163_v42 = vmul.f32 %v162_v39, %v146_v11 }
  0xdc   : > { %v173_v31 = vadd.f32 57.294476, %v172_v30 }
  0xde   : > { %v174_v33 = vmul.f32 %v173_v31, %v153_v18 }
  0xe0   : > { %v176_v34 = vsub.f32 90.0, %v174_v33 }
  0xe2   : > { %v177_v36 = vsel %vm175_vm3, %v176_v34, %v174_v33 }
  0xe3   : > { %v179_v38 = vsub.f32 180.0, %v177_v36 }
  0xe5   : > { %v180_v40 = vsel %vm178_vm5, %v179_v38, %v177_v36 }
  0xe6   : > { %v182_v41 = vsub.f32 0.0, %v180_v40 }
  0xe8   : > { %v183_v43 = vsel %vm181_vm6, %v182_v41, %v180_v40 }
  0xe9   : > { %v184_v44 = vsel %vm561_vm0, %v163_v42, %v183_v43 }
  0xea   : > { %185 = vst [vmem:[%s131_s27] sm:$0xff] %v184_v44 }
  0xeb   : > { %377 = shalt.err (!%p374_p4)
}
  0xec   : > { %s378_s13 = scalar_lea.hbm %s575_s2, 128  ;;  %s382_s20 = scalar_lea.hbm %s622_s1, 256 }
  0xed   : > { %p379_p5 = scmp.ne.s32.totalorder %s575_s2, %s378_s13  ;;  %p383_p0 = scmp.lt.u32.totalorder %s575_s2, %s622_s1 }
  0xee   : > { %p384_p1 = scmp.lt.u32.totalorder %s382_s20, %s378_s13  ;;  %p386_p6 = scmp.lt.u32.totalorder %s378_s13, %s575_s2 }
  0xef   : > { %p380_p8 = pnand %p379_p5, %p633_p11 }
  0xf0   : > { %p385_p3 = por %p384_p1, %p383_p0 }
  0xf1   : > { %p381_p9 = pneg %p380_p8 }
  0xf2   : > { %p387_p12 = por %p386_p6, %p385_p3 }
  0xf4   : > { %p388_p13 = pnand %p387_p12, %p381_p9 }
  0xf6   : > { %391 = shalt.err (!%p388_p13)
}
  0xf7   : > { %284 = dma.vmem_to_hbm [thread:$0]  (%p633_p11), %s577_s28, 128, %s575_s2, %s187_s10  }
  0xf8 PF: > { %s212_s23 = sand.u32 1, %s418_s6   ;;  %p634_p7 = scmp.ne.s32.totalorder %s627_s19, 0 }
  0xf9   : > { %p635_p10 = scmp.ge.s32.totalorder %s430_s9, 2  ;;  %s213_s24 = scalar_lea.sflag [#allocation4], %s212_s23 }
  0xfb   : > { %p291_p2 = pnand %p635_p10, %p634_p7 }
  0xfd   : > { %413 = dma.done.wait (!%p291_p2), %s213_s24, 128  }
  0xfe   : > { %415 = vsyncadd (!%p291_p2), %s213_s24, 4294967168  ;;  %p14_p4 = scmp.ge.s32.totalorder %s471_s12, 4   ;;  %s636_s6 = smov %s422_s7 }
  0xff   : > { %s637_s7 = smov %s426_s8  ;;  %s638_s8 = smov %s483_s15 }
 0x100   : > { %s639_s9 = smov %s471_s12  ;;  %16 = sbr.rel (!%p14_p4) target bundleno = 5 (0x5), region = 69 }
 0x107   :  { %218 = vsyncpa [#allocation3], 1 }
 0x108   :  { %220 = vsyncpa [#allocation3 + $0x1], 1 }
 0x109   :  { %221 = vsyncpa [#allocation4], 1 }
 0x10a   :  { %223 = vsyncpa [#allocation4 + $0x1], 1 }

</bundles_post_ra>
